<compile_context>
chip_gen: v6e
topology: v6e:2x2x1
jax: 0.10.0
libtpu: 0.0.40
codegen_flags: <defaults>
</compile_context>

<pallas_src>
import jax
import jax.numpy as jnp
from jax.experimental import pallas as pl
from jax.experimental.pallas import tpu as pltpu

N_EMBD = 84
HIDDEN = 4 * N_EMBD  # 336

LANE = 128
SUBLANE = 8
TILE_M_MAX = 512


def _round_up(v, m):
    return (v + m - 1) // m * m


def _ffn_kernel(x_ref, w1_ref, b1_ref, w2_ref, b2_ref, o_ref):
    # x_ref: (tm, Cp) f32; w1: (Cp, Hp) bf16; b1: (1, Hp) f32;
    # w2: (Hp, Cp) bf16;   b2: (1, Cp) f32;  o_ref: (tm, Cp) f32
    x = x_ref[...].astype(jnp.bfloat16)
    h = jnp.dot(x, w1_ref[...], preferred_element_type=jnp.float32)
    h = jnp.maximum(h + b1_ref[...], 0.0)                       # bias + ReLU in f32
    y = jnp.dot(h.astype(jnp.bfloat16), w2_ref[...],
                preferred_element_type=jnp.float32)
    # Dropout(p=0.0) -> identity
    o_ref[...] = (y + b2_ref[...]).astype(o_ref.dtype)


def feedforward(x, w1, b1, w2, b2, *, tile_m=TILE_M_MAX):
    """x: (B, T, C) float32. Returns (B, T, C) float32."""
    B, T, C = x.shape
    H = w1.shape[1]
    M = B * T

    # Lane-dense padded feature dims.
    Cp = _round_up(C, LANE)   # 84  -> 128
    Hp = _round_up(H, LANE)   # 336 -> 384

    # Row tile: biggest of tile_m that still respects (8, 128) tiling and M.
    tm = min(tile_m, _round_up(M, SUBLANE))
    Mp = _round_up(M, tm)
    num_tiles = Mp // tm

    x_p = jnp.pad(x.reshape(M, C), ((0, Mp - M), (0, Cp - C)))
    w1_p = jnp.pad(w1, ((0, Cp - C), (0, Hp - H))).astype(jnp.bfloat16)
    b1_p = jnp.pad(b1.reshape(1, -1), ((0, 0), (0, Hp - H)))
    w2_p = jnp.pad(w2, ((0, Hp - H), (0, Cp - C))).astype(jnp.bfloat16)
    b2_p = jnp.pad(b2.reshape(1, -1), ((0, 0), (0, Cp - C)))

    flops = 2 * Mp * (Cp * Hp + Hp * Cp)
    bytes_accessed = (
        Mp * Cp * 4          # x in (f32)
        + Mp * Cp * 4        # y out (f32)
        + (Cp * Hp + Hp * Cp) * 2   # bf16 weights (resident, read once)
        + (Hp + Cp) * 4)     # biases

    out_p = pl.pallas_call(
        _ffn_kernel,
        out_shape=jax.ShapeDtypeStruct((Mp, Cp), x.dtype),
        grid=(num_tiles,),
        in_specs=[
            pl.BlockSpec((tm, Cp), lambda i: (i, 0)),   # x tile (pipelined)
            pl.BlockSpec((Cp, Hp), lambda i: (0, 0)),   # w1 (VMEM-resident)
            pl.BlockSpec((1, Hp), lambda i: (0, 0)),    # b1
            pl.BlockSpec((Hp, Cp), lambda i: (0, 0)),   # w2
            pl.BlockSpec((1, Cp), lambda i: (0, 0)),    # b2
        ],
        out_specs=pl.BlockSpec((tm, Cp), lambda i: (i, 0)),
        compiler_params=pltpu.CompilerParams(
            dimension_semantics=("parallel",),
            vmem_limit_bytes=32 * 1024 * 1024,
        ),
        cost_estimate=pl.CostEstimate(
            flops=flops, transcendentals=0, bytes_accessed=bytes_accessed),
    )(x_p, w1_p, b1_p, w2_p, b2_p)

    return out_p[:M, :C].reshape(B, T, C)


def init_params(key, n_embd=N_EMBD):
    """Deterministic PyTorch-style uniform init: U(-1/sqrt(fan_in), 1/sqrt(fan_in))."""
    k1, k2, k3, k4 = jax.random.split(key, 4)
    hidden = 4 * n_embd
    bound1 = 1.0 / jnp.sqrt(n_embd)
    bound2 = 1.0 / jnp.sqrt(hidden)
    # Stored as (in, out) so the kernel does x @ W directly
    # (equivalent to PyTorch's x @ weight.T with weight of shape (out, in)).
    w1 = jax.random.uniform(k1, (n_embd, hidden), jnp.float32, -bound1, bound1)
    b1 = jax.random.uniform(k2, (hidden,), jnp.float32, -bound1, bound1)
    w2 = jax.random.uniform(k3, (hidden, n_embd), jnp.float32, -bound2, bound2)
    b2 = jax.random.uniform(k4, (n_embd,), jnp.float32, -bound2, bound2)
    return w1, b1, w2, b2


def _reference(x, w1, b1, w2, b2):
    B, T, C = x.shape
    y = jnp.maximum(x.reshape(-1, C) @ w1 + b1, 0.0) @ w2 + b2
    return y.reshape(B, T, C)


if __name__ == "__main__":
    key = jax.random.PRNGKey(0)
    kx, kp, kx2 = jax.random.split(key, 3)
    w1, b1, w2, b2 = init_params(kp)

    # Small shape from the module spec (single grid step).
    B, T = 2, 8
    x = jax.random.normal(kx, (B, T, N_EMBD), dtype=jnp.float32)
    out = jax.block_until_ready(feedforward(x, w1, b1, w2, b2))
    ref = _reference(x, w1, b1, w2, b2)
    assert out.shape == (B, T, N_EMBD)
    # bf16 MXU inputs with f32 accumulation -> loosened tolerance vs f32 ref.
    assert jnp.allclose(out, ref, atol=2e-2, rtol=2e-2)

    # Second shape that exercises multiple row tiles + M padding.
    B2, T2 = 4, 200  # M = 800 -> two 512-row tiles (padded to 1024)
    x2 = jax.random.normal(kx2, (B2, T2, N_EMBD), dtype=jnp.float32)
    out2 = jax.block_until_ready(feedforward(x2, w1, b1, w2, b2))
    ref2 = _reference(x2, w1, b1, w2, b2)
    assert out2.shape == (B2, T2, N_EMBD)
    assert jnp.allclose(out2, ref2, atol=2e-2, rtol=2e-2)

    print("KERNEL_OK")
</pallas_src>

<mosaic_0001>
module attributes {stable_mosaic.version = 11 : i64} {
  func.func @_ffn_kernel(%arg0: i32, %arg1: memref<16x128xf32, #tpu.memory_space<vmem>>, %arg2: memref<128x384xbf16, #tpu.memory_space<vmem>>, %arg3: memref<1x384xf32, #tpu.memory_space<vmem>>, %arg4: memref<384x128xbf16, #tpu.memory_space<vmem>>, %arg5: memref<1x128xf32, #tpu.memory_space<vmem>>, %arg6: memref<16x128xf32, #tpu.memory_space<vmem>>) attributes {dimension_semantics = [#tpu.dimension_semantics<parallel>], iteration_bounds = array<i64: 1>, scalar_prefetch = 0 : i64, scratch_operands = 0 : i64, tpu.core_type = #tpu.core_type<tc>, window_params = [{transform_indices = @transform_0, window_bounds = array<i64: 16, 128>}, {pipeline_mode = #tpu.pipeline_mode<synchronous>, transform_indices = @transform_1, window_bounds = array<i64: 128, 384>}, {pipeline_mode = #tpu.pipeline_mode<synchronous>, transform_indices = @transform_2, window_bounds = array<i64: 1, 384>}, {pipeline_mode = #tpu.pipeline_mode<synchronous>, transform_indices = @transform_3, window_bounds = array<i64: 384, 128>}, {pipeline_mode = #tpu.pipeline_mode<synchronous>, transform_indices = @transform_4, window_bounds = array<i64: 1, 128>}, {transform_indices = @transform_5, window_bounds = array<i64: 16, 128>}]} {
    %c0 = arith.constant 0 : index
    %c0_0 = arith.constant 0 : index
    %0 = vector.load %arg1[%c0, %c0_0] : memref<16x128xf32, #tpu.memory_space<vmem>>, vector<16x128xf32>
    %1 = arith.truncf %0 : vector<16x128xf32> to vector<16x128xbf16>
    %c0_1 = arith.constant 0 : index
    %c0_2 = arith.constant 0 : index
    %2 = vector.load %arg2[%c0_1, %c0_2] : memref<128x384xbf16, #tpu.memory_space<vmem>>, vector<128x384xbf16>
    %cst = arith.constant dense<0.000000e+00> : vector<16x384xf32>
    %3 = tpu.matmul %1, %2, %cst {dimension_numbers = #tpu.dot_dimension_numbers<[1], [0], [0], [1], [0, 0, 1, 1], [], []>} : vector<16x128xbf16>, vector<128x384xbf16>, vector<16x384xf32> -> vector<16x384xf32>
    %c0_3 = arith.constant 0 : index
    %c0_4 = arith.constant 0 : index
    %4 = vector.load %arg3[%c0_3, %c0_4] : memref<1x384xf32, #tpu.memory_space<vmem>>, vector<1x384xf32>
    %5 = vector.broadcast %4 : vector<1x384xf32> to vector<16x384xf32>
    %6 = arith.addf %3, %5 : vector<16x384xf32>
    %cst_5 = arith.constant 0.000000e+00 : f32
    %7 = vector.broadcast %cst_5 : f32 to vector<16x384xf32>
    %8 = arith.maximumf %6, %7 : vector<16x384xf32>
    %9 = arith.truncf %8 : vector<16x384xf32> to vector<16x384xbf16>
    %c0_6 = arith.constant 0 : index
    %c0_7 = arith.constant 0 : index
    %10 = vector.load %arg4[%c0_6, %c0_7] : memref<384x128xbf16, #tpu.memory_space<vmem>>, vector<384x128xbf16>
    %cst_8 = arith.constant dense<0.000000e+00> : vector<16x128xf32>
    %11 = tpu.matmul %9, %10, %cst_8 {dimension_numbers = #tpu.dot_dimension_numbers<[1], [0], [0], [1], [0, 0, 1, 1], [], []>} : vector<16x384xbf16>, vector<384x128xbf16>, vector<16x128xf32> -> vector<16x128xf32>
    %c0_9 = arith.constant 0 : index
    %c0_10 = arith.constant 0 : index
    %12 = vector.load %arg5[%c0_9, %c0_10] : memref<1x128xf32, #tpu.memory_space<vmem>>, vector<1x128xf32>
    %13 = vector.broadcast %12 : vector<1x128xf32> to vector<16x128xf32>
    %14 = arith.addf %11, %13 : vector<16x128xf32>
    %c0_11 = arith.constant 0 : index
    %c0_12 = arith.constant 0 : index
    %15 = vector.load %arg6[%c0_11, %c0_12] : memref<16x128xf32, #tpu.memory_space<vmem>>, vector<16x128xf32>
    tpu.vector_store %arg6[%c0_11, %c0_12], %14 {strides = array<i32>} : memref<16x128xf32, #tpu.memory_space<vmem>>, vector<16x128xf32>,
    return
  }
  func.func @transform_0(%arg0: i32) -> (i32, i32) {
    %c0_i32 = arith.constant 0 : i32
    %c0_i32_0 = arith.constant 0 : i32
    return %arg0, %c0_i32 : i32, i32
  }
  func.func @transform_1(%arg0: i32) -> (i32, i32) {
    %c0_i32 = arith.constant 0 : i32
    %c0_i32_0 = arith.constant 0 : i32
    %c0_i32_1 = arith.constant 0 : i32
    return %c0_i32, %c0_i32_0 : i32, i32
  }
  func.func @transform_2(%arg0: i32) -> (i32, i32) {
    %c0_i32 = arith.constant 0 : i32
    %c0_i32_0 = arith.constant 0 : i32
    %c0_i32_1 = arith.constant 0 : i32
    return %c0_i32, %c0_i32_0 : i32, i32
  }
  func.func @transform_3(%arg0: i32) -> (i32, i32) {
    %c0_i32 = arith.constant 0 : i32
    %c0_i32_0 = arith.constant 0 : i32
    %c0_i32_1 = arith.constant 0 : i32
    return %c0_i32, %c0_i32_0 : i32, i32
  }
  func.func @transform_4(%arg0: i32) -> (i32, i32) {
    %c0_i32 = arith.constant 0 : i32
    %c0_i32_0 = arith.constant 0 : i32
    %c0_i32_1 = arith.constant 0 : i32
    return %c0_i32, %c0_i32_0 : i32, i32
  }
  func.func @transform_5(%arg0: i32) -> (i32, i32) {
    %c0_i32 = arith.constant 0 : i32
    %c0_i32_0 = arith.constant 0 : i32
    return %arg0, %c0_i32 : i32, i32
  }
}

</mosaic_0001>

<bundles_post_ra>
// kernel: tpu_custom_call.1
= control target key start
LH: loop header
LB: loop body
LE: loop exit
PB: predicated region body
PF: predicated region fallthrough
CT: control target
= control target key end

     0   :  { %10 = vsyncpa [#allocation3], 0  ;;  %s1008_s0 = inlined_call_operand.hbm [shape: f32[16,128], index: 0, kind: input, shape index: {}]   ;;  %s1009_s1 = inlined_call_operand.hbm [shape: bf16[128,384], index: 1, kind: input, shape index: {}]   ;;  %s1010_s2 = inlined_call_operand.vmem [shape: f32[1,384], index: 2, kind: input, shape index: {}]   ;;  %s1011_s3 = inlined_call_operand.hbm [shape: bf16[384,128], index: 3, kind: input, shape index: {}]   ;;  %s1012_s4 = inlined_call_operand.vmem [shape: f32[1,128], index: 4, kind: input, shape index: {}]   ;;  %s1013_s5 = inlined_call_operand.hbm [shape: f32[16,128], index: 5, kind: output, shape index: {}]  }
   0x1   :  { %11 = vsyncpa [#allocation6], 0 }
   0x2   :  { %12 = vsyncpa [#allocation4], 0  ;;  %s921_s18 = smov [#allocation5]  }
   0x3   :  { %s30_s19 = sshll.u32 %s921_s18, 4  ;;  %s31_s19 = int_to_ptr.vmem [resolvable:$true] %s30_s19 }
   0x4   :  { %s843_s20 = scalar_lea.vmem %s31_s19, 3072  ;;  %p848_p1 = scmp.lt.s32.totalorder %s31_s19, %s31_s19 }
   0x5   :  { %p844_p0 = scmp.ne.s32.totalorder %s31_s19, %s843_s20  ;;  %p849_p2 = scmp.lt.s32.totalorder %s843_s20, %s843_s20 }
   0x7   :  { %p850_p3 = por %p849_p2, %p848_p1 }
   0x9   :  { %p851_p4 = pnand %p850_p3, %p844_p0 }
   0xb   :  { %854 = shalt.err (!%p851_p4)
}
   0xc   :  { %s922_s21 = smov 192   ;;  %s923_s22 = smov 12  }
   0xd   :  { %36 = dma.hbm_to_vmem [thread:$0]  %s1009_s1, 3072, %s31_s19, [#allocation6], %s922_s21, %s922_s21, %s923_s22  }
   0xe   :  { %s924_s25 = smov [#allocation2]  }
   0xf   :  { %s18_s26 = sshll.u32 %s924_s25, 4  ;;  %s19_s26 = int_to_ptr.vmem [resolvable:$true] %s18_s26 }
  0x10   :  { %s863_s27 = scalar_lea.vmem %s19_s26, 256  ;;  %p868_p6 = scmp.lt.s32.totalorder %s19_s26, %s19_s26 }
  0x11   :  { %p864_p5 = scmp.ne.s32.totalorder %s19_s26, %s863_s27  ;;  %p869_p7 = scmp.lt.s32.totalorder %s863_s27, %s863_s27 }
  0x13   :  { %p870_p8 = por %p869_p7, %p868_p6 }
  0x15   :  { %p871_p9 = pnand %p870_p8, %p864_p5 }
  0x17   :  { %874 = shalt.err (!%p871_p9)
}
  0x18   :  { %s925_s28 = smov 128   ;;  %s926_s29 = smov 8  }
  0x19   :  { %24 = dma.hbm_to_vmem [thread:$0]  %s1008_s0, 256, %s19_s26, [#allocation3], %s925_s28, %s925_s28, %s926_s29  }
  0x1a   :  { %s927_s1 = smov [#allocation7]  }
  0x1b   :  { %s44_s7 = sshll.u32 %s927_s1, 4  ;;  %s45_s7 = int_to_ptr.vmem [resolvable:$true] %s44_s7 }
  0x1c   :  { %s883_s8 = scalar_lea.vmem %s45_s7, 3072  ;;  %p888_p11 = scmp.lt.s32.totalorder %s45_s7, %s45_s7 }
  0x1d   :  { %p884_p10 = scmp.ne.s32.totalorder %s45_s7, %s883_s8  ;;  %p889_p12 = scmp.lt.s32.totalorder %s883_s8, %s883_s8 }
  0x1f   :  { %p890_p13 = por %p889_p12, %p888_p11 }
  0x21   :  { %p891_p0 = pnand %p890_p13, %p884_p10 }
  0x23   :  { %894 = shalt.err (!%p891_p0)
}
  0x24   :  { %s928_s9 = smov 64   ;;  %s929_s10 = smov 4  }
  0x25   :  { %50 = dma.hbm_to_vmem [thread:$0]  %s1011_s3, 3072, %s45_s7, [#allocation6], %s928_s9, %s928_s9, %s929_s10  }
  0x26   :  { %915 = dma.done.wait [#allocation3], 256  }
  0x27   :  { %916 = vsyncadd [#allocation3], 4294967040 }
  0x28   :  { %917 = dma.done.wait [#allocation6], 6144  }
  0x29   :  { %918 = vsyncadd [#allocation6], 4294961152  ;;  %v930_v0 = vmov 0.0   ;;  %vm931_vm0 = vmmov 0   ;;  %v932_v1 = vmov 0   ;;  %v63_v25 = vld [vmem:[#allocation2] sm:$0xff]  ;;  %v100_v53 = vlaneseq }
  0x2a   :  { %726 = vmatprep.subr.bf16.mxu1 %v930_v0  ;;  %742 = vmatprep.mubr.msk.bf16.mxu1 %vm931_vm0, %v930_v0  ;;  %v779_v2 = vld [vmem:[#allocation5 + $0xac] ss:$12 sps:$4 sm:$0xff]   ;;  %v781_v3 = vld [vmem:[#allocation5 + $0xb0] ss:$12 sps:$4 sm:$0xff]   ;;  %v782_v4 = vld [vmem:[#allocation5 + $0xa8] ss:$12 sps:$4 sm:$0xff]  }
  0x2b   :  { %275 = vmatprep.mubr.bf16.mxu0 %v932_v1  ;;  %243 = vmatprep.subr.bf16.mxu0 %v779_v2  ;;  %v783_v5 = vld [vmem:[#allocation5 + $0x94] ss:$12 sps:$4 sm:$0xff]   ;;  %v785_v6 = vld [vmem:[#allocation5 + $0x98] ss:$12 sps:$4 sm:$0xff]   ;;  %v786_v7 = vld [vmem:[#allocation5 + $0x90] ss:$12 sps:$4 sm:$0xff]  }
  0x2c   :  { %727 = vmatpush3.bf16.msra.mxu1 %v781_v3  ;;  %244 = vmatpush1.bf16.msra.mxu0 %v782_v4  ;;  %v787_v8 = vld [vmem:[#allocation5 + $0x7c] ss:$12 sps:$4 sm:$0xff]   ;;  %v789_v9 = vld [vmem:[#allocation5 + $0x80] ss:$12 sps:$4 sm:$0xff]   ;;  %v790_v10 = vld [vmem:[#allocation5 + $0x78] ss:$12 sps:$4 sm:$0xff]  }
  0x2d   :  { %728 = vmatprep.subr.bf16.mxu1 %v930_v0  ;;  %245 = vmatprep.subr.bf16.mxu0 %v783_v5  ;;  %v791_v11 = vld [vmem:[#allocation5 + $0x64] ss:$12 sps:$4 sm:$0xff]   ;;  %v793_v12 = vld [vmem:[#allocation5 + $0x68] ss:$12 sps:$4 sm:$0xff]   ;;  %v794_v13 = vld [vmem:[#allocation5 + $0x60] ss:$12 sps:$4 sm:$0xff]  }
  0x2e   :  { %v795_v14 = vld [vmem:[#allocation5 + $0x4c] ss:$12 sps:$4 sm:$0xff]   ;;  %v797_v15 = vld [vmem:[#allocation5 + $0x50] ss:$12 sps:$4 sm:$0xff]   ;;  %v798_v16 = vld [vmem:[#allocation5 + $0x48] ss:$12 sps:$4 sm:$0xff]  }
  0x2f   :  { %v799_v17 = vld [vmem:[#allocation5 + $0x34] ss:$12 sps:$4 sm:$0xff]   ;;  %v801_v18 = vld [vmem:[#allocation5 + $0x38] ss:$12 sps:$4 sm:$0xff]   ;;  %v802_v19 = vld [vmem:[#allocation5 + $0x30] ss:$12 sps:$4 sm:$0xff]  }
  0x30   :  { %729 = vmatpush3.bf16.msra.mxu1 %v785_v6  ;;  %246 = vmatpush1.bf16.msra.mxu0 %v786_v7  ;;  %v803_v20 = vld [vmem:[#allocation5 + $0x1c] ss:$12 sps:$4 sm:$0xff]   ;;  %v805_v21 = vld [vmem:[#allocation5 + $0x20] ss:$12 sps:$4 sm:$0xff]   ;;  %v806_v22 = vld [vmem:[#allocation5 + $0x18] ss:$12 sps:$4 sm:$0xff]  }
  0x31   :  { %730 = vmatprep.subr.bf16.mxu1 %v930_v0  ;;  %247 = vmatprep.subr.bf16.mxu0 %v787_v8  ;;  %v807_v23 = vld [vmem:[#allocation5 + $0x4] ss:$12 sps:$4 sm:$0xff]   ;;  %v809_v24 = vld [vmem:[#allocation5 + $0x8] ss:$12 sps:$4 sm:$0xff]   ;;  %v64_v26 = vld [vmem:[#allocation2 + $0x8] sm:$0xff]  ;;  %v101_v54 = vshrl.u32 %v100_v53, 7 }
  0x32   :  { %v810_v27 = vld [vmem:[#allocation5] ss:$12 sps:$4 sm:$0xff]   ;;  %v812_v28 = vld [vmem:[#allocation7 + $0x78] sm:$0xff]   ;;  %v65_v29 = vpack.c.bf16 %v64_v26, %v63_v25  ;;  %v814_v32 = vld [vmem:[#allocation7 + $0xb0] sm:$0xff]   ;;  %s933_s14 = smov [#allocation8]  }
  0x33   :  { %v811_v30 = vld [vmem:[#allocation7 + $0xb8] sm:$0xff]   ;;  %v815_v33 = vld [vmem:[#allocation7 + $0x70] sm:$0xff]   ;;  %v818_v35 = vld [vmem:[#allocation7 + $0x68] sm:$0xff]   ;;  %v110_v55 = vsub.s32 2, %v101_v54  ;;  %v106_v58 = vsub.s32 1, %v101_v54  ;;  %v102_v59 = vsub.s32 0, %v101_v54 }
  0x34   :  { %731 = vmatpush3.bf16.msra.mxu1 %v789_v9  ;;  %248 = vmatpush1.bf16.msra.mxu0 %v790_v10  ;;  %v813_v31 = vld [vmem:[#allocation7 + $0x38] sm:$0xff]   ;;  %v816_v34 = vld [vmem:[#allocation7 + $0x30] sm:$0xff]   ;;  %v817_v36 = vld [vmem:[#allocation7 + $0xa8] sm:$0xff]   ;;  %s624_s15 = sshll.u32 %s933_s14, 4  ;;  %s625_s15 = int_to_ptr.vmem [resolvable:$true] %s624_s15 }
  0x35   :  { %732 = vmatprep.subr.bf16.mxu1 %v930_v0  ;;  %249 = vmatprep.subr.bf16.mxu0 %v791_v11  ;;  %v819_v37 = vld [vmem:[#allocation7 + $0x28] sm:$0xff]   ;;  %v821_v38 = vld [vmem:[#allocation7 + $0x60] sm:$0xff]   ;;  %v824_v41 = vld [vmem:[#allocation7 + $0x58] sm:$0xff]   ;;  %s895_s16 = scalar_lea.vmem %s625_s15, 256  ;;  %p900_p2 = scmp.lt.s32.totalorder %s625_s15, %s625_s15 }
  0x36   :  { %v820_v39 = vld [vmem:[#allocation7 + $0xa0] sm:$0xff]   ;;  %v823_v42 = vld [vmem:[#allocation7 + $0x98] sm:$0xff]   ;;  %v826_v44 = vld [vmem:[#allocation7 + $0x90] sm:$0xff]   ;;  %p896_p1 = scmp.ne.s32.totalorder %s625_s15, %s895_s16  ;;  %p901_p3 = scmp.lt.s32.totalorder %s895_s16, %s895_s16 }
  0x37   :  { %v822_v40 = vld [vmem:[#allocation7 + $0x20] sm:$0xff]   ;;  %v825_v43 = vld [vmem:[#allocation7 + $0x18] sm:$0xff]   ;;  %v827_v45 = vld [vmem:[#allocation7 + $0x50] sm:$0xff]  }
  0x38   :  { %733 = vmatpush3.bf16.msra.mxu1 %v793_v12  ;;  %250 = vmatpush1.bf16.msra.mxu0 %v794_v13  ;;  %v828_v46 = vld [vmem:[#allocation7 + $0x10] sm:$0xff]   ;;  %v829_v47 = vld [vmem:[#allocation7 + $0x88] sm:$0xff]   ;;  %v832_v50 = vld [vmem:[#allocation7 + $0x80] sm:$0xff]   ;;  %p902_p4 = por %p901_p3, %p900_p2 }
  0x39   :  { %734 = vmatprep.subr.bf16.mxu1 %v930_v0  ;;  %251 = vmatprep.subr.bf16.mxu0 %v795_v14  ;;  %v830_v48 = vld [vmem:[#allocation7 + $0x48] sm:$0xff]   ;;  %v833_v51 = vld [vmem:[#allocation7 + $0x40] sm:$0xff]   ;;  %v98_v56 = vld [vmem:[%s1010_s2] sm:$0x7] }
  0x3a   :  { %v831_v49 = vld [vmem:[#allocation7 + $0x8] sm:$0xff]   ;;  %v834_v52 = vld [vmem:[#allocation7] sm:$0xff]   ;;  %v111_v57 = vrot.slane %v98_v56, %v110_v55  ;;  %v103_v1 = vrot.slane %v98_v56, %v102_v59  ;;  %v661_v25 = vld [vmem:[%s1012_s4] ss:$0 sm:$0xff]  ;;  %p903_p5 = pnand %p902_p4, %p896_p1 }
  0x3c   :  { %735 = vmatpush3.bf16.msra.mxu1 %v797_v15  ;;  %252 = vmatpush1.bf16.msra.mxu0 %v798_v16 }
  0x3d   :  { %736 = vmatprep.subr.bf16.mxu1 %v930_v0  ;;  %253 = vmatprep.subr.bf16.mxu0 %v799_v17 }
  0x40   :  { %737 = vmatpush3.bf16.msra.mxu1 %v801_v18  ;;  %254 = vmatpush1.bf16.msra.mxu0 %v802_v19 }
  0x41   :  { %738 = vmatprep.subr.bf16.mxu1 %v930_v0  ;;  %255 = vmatprep.subr.bf16.mxu0 %v803_v20 }
  0x44   :  { %739 = vmatpush3.bf16.msra.mxu1 %v805_v21  ;;  %256 = vmatpush1.bf16.msra.mxu0 %v806_v22 }
  0x45   :  { %740 = vmatprep.subr.bf16.mxu1 %v930_v0  ;;  %257 = vmatprep.subr.bf16.mxu0 %v807_v23 }
  0x48   :  { %741 = vmatpush3.bf16.msra.mxu1 %v809_v24  ;;  %258 = vmatpush1.bf16.msra.mxu0 %v810_v27 }
  0x49   :  { %746 = vmatprep.subr.bf16.mxu1 %v930_v0  ;;  %695 = vmatprep.subr.bf16.mxu0 %v812_v28 }
  0x4b   :  { %743 = vmatmul.mubr.bf16.vlgmr.msra.gmra.mxu1 %v65_v29  ;;  %276 = vmatmul.mubr.bf16.vlgmr.msra.gmra.mxu0 %v65_v29 }
  0x4c   :  { %747 = vmatpush3.bf16.msra.mxu1 %v811_v30  ;;  %696 = vmatpush3.bf16.msra.mxu0 %v813_v31 }
  0x4d   :  { %748 = vmatprep.subr.bf16.mxu1 %v930_v0  ;;  %697 = vmatprep.subr.bf16.mxu0 %v815_v33 }
  0x4e   :  { %762 = vmatprep.mubr.msk.bf16.mxu1 %vm931_vm0, %v930_v0 }
  0x50   :  { %749 = vmatpush3.bf16.msra.mxu1 %v814_v32  ;;  %698 = vmatpush3.bf16.msra.mxu0 %v816_v34 }
  0x51   :  { %750 = vmatprep.subr.bf16.mxu1 %v930_v0  ;;  %699 = vmatprep.subr.bf16.mxu0 %v818_v35 }
  0x54   :  { %751 = vmatpush3.bf16.msra.mxu1 %v817_v36  ;;  %700 = vmatpush3.bf16.msra.mxu0 %v819_v37 }
  0x55   :  { %752 = vmatprep.subr.bf16.mxu1 %v930_v0  ;;  %701 = vmatprep.subr.bf16.mxu0 %v821_v38 }
  0x58   :  { %753 = vmatpush3.bf16.msra.mxu1 %v820_v39  ;;  %702 = vmatpush3.bf16.msra.mxu0 %v822_v40 }
  0x59   :  { %754 = vmatprep.subr.bf16.mxu1 %v930_v0  ;;  %703 = vmatprep.subr.bf16.mxu0 %v824_v41 }
  0x5c   :  { %755 = vmatpush3.bf16.msra.mxu1 %v823_v42  ;;  %704 = vmatpush3.bf16.msra.mxu0 %v825_v43 }
  0x5d   :  { %756 = vmatprep.subr.bf16.mxu1 %v930_v0  ;;  %705 = vmatprep.subr.bf16.mxu0 %v827_v45 }
  0x60   :  { %757 = vmatpush3.bf16.msra.mxu1 %v826_v44  ;;  %706 = vmatpush3.bf16.msra.mxu0 %v828_v46 }
  0x61   :  { %758 = vmatprep.subr.bf16.mxu1 %v930_v0  ;;  %707 = vmatprep.subr.bf16.mxu0 %v830_v48 }
  0x64   :  { %759 = vmatpush3.bf16.msra.mxu1 %v829_v47  ;;  %708 = vmatpush3.bf16.msra.mxu0 %v831_v49 }
  0x65   :  { %760 = vmatprep.subr.bf16.mxu1 %v930_v0  ;;  %709 = vmatprep.subr.bf16.mxu0 %v833_v51  ;;  %v107_v0 = vrot.slane %v98_v56, %v106_v58 }
  0x68   :  { %761 = vmatpush3.bf16.msra.mxu1 %v832_v50  ;;  %710 = vmatpush3.bf16.msra.mxu0 %v834_v52 }
 0x10b   :  { %v320_v60 = vpop.f32.mrf.mxu1  ;;  %v277_v62 = vpop.f32.mrf.mxu0 }
 0x10c   :  { %v321_v61 = vadd.f32 %v320_v60, %v111_v57  ;;  %v278_v10 = vadd.f32 %v277_v62, %v103_v1 }
 0x10d   :  { %v744_v63 = vpop.f32.mrf.mxu1  ;;  %v279_v2 = vpop.f32.mrf.mxu0 }
 0x10e   :  { %v329_v4 = vmax.f32 %v321_v61, 0.0  ;;  %v280_v7 = vadd.f32 %v279_v2, %v107_v0  ;;  %v327_v18 = vmax.f32 %v278_v10, 0.0 }
 0x10f   :  { %v323_v3 = vpop.f32.mrf.mxu1  ;;  %v281_v6 = vpop.f32.mrf.mxu0 }
 0x110   :  { %v324_v5 = vadd.f32 %v323_v3, %v111_v57  ;;  %v282_v8 = vadd.f32 %v281_v6, %v103_v1  ;;  %v328_v16 = vmax.f32 %v280_v7, 0.0 }
 0x111   :  { %v745_v9 = vpop.f32.mrf.mxu1  ;;  %v283_v12 = vpop.f32.mrf.mxu0 }
 0x112   :  { %v332_v11 = vmax.f32 %v324_v5, 0.0  ;;  %v284_v13 = vadd.f32 %v283_v12, %v107_v0  ;;  %v330_v15 = vmax.f32 %v282_v8, 0.0 }
 0x114   :  { %v335_v14 = vpack.c.bf16 %v332_v11, %v329_v4  ;;  %v331_v17 = vmax.f32 %v284_v13, 0.0  ;;  %v333_v20 = vpack.c.bf16 %v330_v15, %v327_v18 }
 0x116   :  { %763 = vmatmul.mubr.bf16.vlgmr.msra.gmra.mxu1 %v335_v14  ;;  %v334_v19 = vpack.c.bf16 %v331_v17, %v328_v16 }
 0x118   :  { %567 = vmatprep.mubr.bf16.mxu0 %v334_v19 }
 0x119   :  { %568 = vmatmul.mubr.bf16.vlgmr.msra.gmra.mxu0 %v333_v20 }
 0x1d6   :  { %v610_v21 = vpop.f32.mrf.mxu1 }
 0x1d8   :  { %v764_v22 = vpop.f32.mrf.mxu1 }
 0x1d9   :  { %v711_v23 = vpop.f32.mrf.mxu0 }
 0x1da   :  { %v613_v24 = vpop.f32.mrf.mxu1 }
 0x1db   :  { %v712_v26 = vpop.f32.mrf.mxu0 }
 0x1dc   :  { %v765_v27 = vpop.f32.mrf.mxu1  ;;  %v713_v28 = vadd.f32 %v712_v26, %v711_v23 }
 0x1dd   :  { %v714_v29 = vpop.f32.mrf.mxu0 }
 0x1de   :  { %v570_v30 = vadd.f32 %v713_v28, %v661_v25 }
 0x1df   :  { %v715_v31 = vpop.f32.mrf.mxu0 }
 0x1e0   :  { %v611_v32 = vadd.f32 %v610_v21, %v570_v30  ;;  %v716_v33 = vadd.f32 %v715_v31, %v714_v29 }
 0x1e2   :  { %617 = vst [vmem:[#allocation8] sm:$0xff] %v611_v32  ;;  %v573_v34 = vadd.f32 %v716_v33, %v661_v25 }
 0x1e4   :  { %v614_v35 = vadd.f32 %v613_v24, %v573_v34 }
 0x1e6   :  { %618 = vst [vmem:[#allocation8 + $0x8] sm:$0xff] %v614_v35 }
 0x1e7   :  { %906 = shalt.err (!%p903_p5)
}
 0x1e8   :  { %630 = dma.vmem_to_hbm [thread:$0]  %s625_s15, 256, %s1013_s5, [#allocation4], %s925_s28, %s925_s28, %s926_s29  }
 0x1e9   :  { %919 = dma.done.wait [#allocation4], 256  }
 0x1ea   :  { %920 = vsyncadd [#allocation4], 4294967040 }
 0x1eb   :  { %634 = vsyncpa [#allocation3], 1 }
 0x1ec   :  { %635 = vsyncpa [#allocation6], 1 }
 0x1ed   :  { %636 = vsyncpa [#allocation4], 1 }

</bundles_post_ra>
